<compile_context>
chip_gen: v5e
topology: v5e:2x2
jax: 0.10.0
libtpu: 0.0.40
codegen_flags: <defaults>
</compile_context>

<pallas_src>
import jax
import jax.numpy as jnp
from jax.experimental import pallas as pl
from jax.experimental.pallas import tpu as pltpu


def _cat_channels_dma_kernel(x1_hbm, x2_hbm, x3_hbm, x4_hbm, o_hbm, sem):
    # Raw HBM refs (memory_space=pl.ANY): issue all 4 per-channel DMAs,
    # then wait on all 4 so they overlap with each other.
    copies = []
    for i, x_hbm in enumerate((x1_hbm, x2_hbm, x3_hbm, x4_hbm)):
        cp = pltpu.make_async_copy(
            x_hbm,                              # (N, 1, H, W) in HBM
            o_hbm.at[:, i:i + 1, :, :],         # channel slot i of (N, 4, H, W)
            sem.at[i],
        )
        cp.start()
        copies.append(cp)
    for cp in copies:
        cp.wait()


def cat_slice_cat(x1, x2, x3, x4):
    N, C, H, W = x1.shape
    assert C == 1
    assert x2.shape == x1.shape and x3.shape == x1.shape and x4.shape == x1.shape
    assert x2.dtype == x1.dtype and x3.dtype == x1.dtype and x4.dtype == x1.dtype

    out_shape = jax.ShapeDtypeStruct((N, 4 * C, H, W), x1.dtype)

    # No auto-tiling / no VMEM staging: hand the kernel raw HBM refs and let
    # it do the minimal-traffic copy itself.
    hbm_spec = pl.BlockSpec(memory_space=pl.ANY)

    v1 = pl.pallas_call(
        _cat_channels_dma_kernel,
        out_shape=out_shape,
        in_specs=[hbm_spec, hbm_spec, hbm_spec, hbm_spec],
        out_specs=hbm_spec,
        scratch_shapes=[pltpu.SemaphoreType.DMA((4,))],
    )(x1, x2, x3, x4)

    # v2 = v1[:, 0:536870911]  -> clamps to the full tensor, never used.
    # v3 = v1[:, 536870912:]   -> clamps to an empty channel slice.
    # v4 = cat([v1, v3], dim=1) == v1, so return v1 directly (guarantees zero
    # extra HBM->HBM copy for the degenerate empty concat).
    return v1


if __name__ == "__main__":
    key = jax.random.PRNGKey(0)
    k1, k2, k3, k4 = jax.random.split(key, 4)
    # Small shapes consistent with the module's (1, 1, 256, 256) inputs.
    shape = (1, 1, 64, 128)
    x1 = jax.random.normal(k1, shape, dtype=jnp.float32)
    x2 = jax.random.normal(k2, shape, dtype=jnp.float32)
    x3 = jax.random.normal(k3, shape, dtype=jnp.float32)
    x4 = jax.random.normal(k4, shape, dtype=jnp.float32)

    out = jax.jit(cat_slice_cat)(x1, x2, x3, x4)
    out = jax.block_until_ready(out)

    # Correctness check against plain-JAX reference semantics.
    ref = jnp.concatenate([x1, x2, x3, x4], axis=1)
    assert out.shape == (1, 4, 64, 128), out.shape
    assert jnp.array_equal(out, ref), "mismatch vs reference concatenation"

    print("KERNEL_OK")
</pallas_src>

<mosaic_0001>
module attributes {stable_mosaic.version = 11 : i64} {
  func.func @_cat_channels_dma_kernel(%arg0: memref<1x1x64x128xf32, #tpu.memory_space<any>>, %arg1: memref<1x1x64x128xf32, #tpu.memory_space<any>>, %arg2: memref<1x1x64x128xf32, #tpu.memory_space<any>>, %arg3: memref<1x1x64x128xf32, #tpu.memory_space<any>>, %arg4: memref<1x4x64x128xf32, #tpu.memory_space<any>>, %arg5: memref<4x!tpu.dma_semaphore, #tpu.memory_space<semaphore_mem>>) attributes {dimension_semantics = [], scalar_prefetch = 0 : i64, scratch_operands = 1 : i64, tpu.core_type = #tpu.core_type<tc>} {
    %c0_i32 = arith.constant 0 : i32
    %c0_i32_0 = arith.constant 0 : i32
    %c0_i32_1 = arith.constant 0 : i32
    %c0_i32_2 = arith.constant 0 : i32
    %c0_i32_3 = arith.constant 0 : i32
    %0 = tpu.memref_slice %arg4[%c0_i32_0, %c0_i32_1, %c0_i32_2, %c0_i32_3] : memref<1x4x64x128xf32, #tpu.memory_space<any>> -> memref<1x1x64x128xf32, #tpu.memory_space<any>>
    %1 = tpu.memref_slice %arg5[%c0_i32] : memref<4x!tpu.dma_semaphore, #tpu.memory_space<semaphore_mem>> -> memref<1x!tpu.dma_semaphore, #tpu.memory_space<semaphore_mem>>
    %2 = tpu.memref_squeeze %1 : memref<1x!tpu.dma_semaphore, #tpu.memory_space<semaphore_mem>> -> memref<!tpu.dma_semaphore, #tpu.memory_space<semaphore_mem>>
    tpu.enqueue_dma source(%arg0 : memref<1x1x64x128xf32, #tpu.memory_space<any>>) target(%0 : memref<1x1x64x128xf32, #tpu.memory_space<any>>) target_semaphore(%2 : memref<!tpu.dma_semaphore, #tpu.memory_space<semaphore_mem>>)
    %c1_i32 = arith.constant 1 : i32
    %c0_i32_4 = arith.constant 0 : i32
    %c1_i32_5 = arith.constant 1 : i32
    %c0_i32_6 = arith.constant 0 : i32
    %c0_i32_7 = arith.constant 0 : i32
    %3 = tpu.memref_slice %arg4[%c0_i32_4, %c1_i32_5, %c0_i32_6, %c0_i32_7] : memref<1x4x64x128xf32, #tpu.memory_space<any>> -> memref<1x1x64x128xf32, #tpu.memory_space<any>>
    %4 = tpu.memref_slice %arg5[%c1_i32] : memref<4x!tpu.dma_semaphore, #tpu.memory_space<semaphore_mem>> -> memref<1x!tpu.dma_semaphore, #tpu.memory_space<semaphore_mem>>
    %5 = tpu.memref_squeeze %4 : memref<1x!tpu.dma_semaphore, #tpu.memory_space<semaphore_mem>> -> memref<!tpu.dma_semaphore, #tpu.memory_space<semaphore_mem>>
    tpu.enqueue_dma source(%arg1 : memref<1x1x64x128xf32, #tpu.memory_space<any>>) target(%3 : memref<1x1x64x128xf32, #tpu.memory_space<any>>) target_semaphore(%5 : memref<!tpu.dma_semaphore, #tpu.memory_space<semaphore_mem>>)
    %c2_i32 = arith.constant 2 : i32
    %c0_i32_8 = arith.constant 0 : i32
    %c2_i32_9 = arith.constant 2 : i32
    %c0_i32_10 = arith.constant 0 : i32
    %c0_i32_11 = arith.constant 0 : i32
    %6 = tpu.memref_slice %arg4[%c0_i32_8, %c2_i32_9, %c0_i32_10, %c0_i32_11] : memref<1x4x64x128xf32, #tpu.memory_space<any>> -> memref<1x1x64x128xf32, #tpu.memory_space<any>>
    %7 = tpu.memref_slice %arg5[%c2_i32] : memref<4x!tpu.dma_semaphore, #tpu.memory_space<semaphore_mem>> -> memref<1x!tpu.dma_semaphore, #tpu.memory_space<semaphore_mem>>
    %8 = tpu.memref_squeeze %7 : memref<1x!tpu.dma_semaphore, #tpu.memory_space<semaphore_mem>> -> memref<!tpu.dma_semaphore, #tpu.memory_space<semaphore_mem>>
    tpu.enqueue_dma source(%arg2 : memref<1x1x64x128xf32, #tpu.memory_space<any>>) target(%6 : memref<1x1x64x128xf32, #tpu.memory_space<any>>) target_semaphore(%8 : memref<!tpu.dma_semaphore, #tpu.memory_space<semaphore_mem>>)
    %c3_i32 = arith.constant 3 : i32
    %c0_i32_12 = arith.constant 0 : i32
    %c3_i32_13 = arith.constant 3 : i32
    %c0_i32_14 = arith.constant 0 : i32
    %c0_i32_15 = arith.constant 0 : i32
    %9 = tpu.memref_slice %arg4[%c0_i32_12, %c3_i32_13, %c0_i32_14, %c0_i32_15] : memref<1x4x64x128xf32, #tpu.memory_space<any>> -> memref<1x1x64x128xf32, #tpu.memory_space<any>>
    %10 = tpu.memref_slice %arg5[%c3_i32] : memref<4x!tpu.dma_semaphore, #tpu.memory_space<semaphore_mem>> -> memref<1x!tpu.dma_semaphore, #tpu.memory_space<semaphore_mem>>
    %11 = tpu.memref_squeeze %10 : memref<1x!tpu.dma_semaphore, #tpu.memory_space<semaphore_mem>> -> memref<!tpu.dma_semaphore, #tpu.memory_space<semaphore_mem>>
    tpu.enqueue_dma source(%arg3 : memref<1x1x64x128xf32, #tpu.memory_space<any>>) target(%9 : memref<1x1x64x128xf32, #tpu.memory_space<any>>) target_semaphore(%11 : memref<!tpu.dma_semaphore, #tpu.memory_space<semaphore_mem>>)
    %c0_i32_16 = arith.constant 0 : i32
    %c0_i32_17 = arith.constant 0 : i32
    %c0_i32_18 = arith.constant 0 : i32
    %c0_i32_19 = arith.constant 0 : i32
    %c0_i32_20 = arith.constant 0 : i32
    %12 = tpu.memref_slice %arg4[%c0_i32_17, %c0_i32_18, %c0_i32_19, %c0_i32_20] : memref<1x4x64x128xf32, #tpu.memory_space<any>> -> memref<1x1x64x128xf32, #tpu.memory_space<any>>
    %13 = tpu.memref_slice %arg5[%c0_i32_16] : memref<4x!tpu.dma_semaphore, #tpu.memory_space<semaphore_mem>> -> memref<1x!tpu.dma_semaphore, #tpu.memory_space<semaphore_mem>>
    %14 = tpu.memref_squeeze %13 : memref<1x!tpu.dma_semaphore, #tpu.memory_space<semaphore_mem>> -> memref<!tpu.dma_semaphore, #tpu.memory_space<semaphore_mem>>
    tpu.wait_dma2 semaphore(%14 : memref<!tpu.dma_semaphore, #tpu.memory_space<semaphore_mem>>) src(%arg0 : memref<1x1x64x128xf32, #tpu.memory_space<any>>) dst(%12 : memref<1x1x64x128xf32, #tpu.memory_space<any>>)
    %c1_i32_21 = arith.constant 1 : i32
    %c0_i32_22 = arith.constant 0 : i32
    %c1_i32_23 = arith.constant 1 : i32
    %c0_i32_24 = arith.constant 0 : i32
    %c0_i32_25 = arith.constant 0 : i32
    %15 = tpu.memref_slice %arg4[%c0_i32_22, %c1_i32_23, %c0_i32_24, %c0_i32_25] : memref<1x4x64x128xf32, #tpu.memory_space<any>> -> memref<1x1x64x128xf32, #tpu.memory_space<any>>
    %16 = tpu.memref_slice %arg5[%c1_i32_21] : memref<4x!tpu.dma_semaphore, #tpu.memory_space<semaphore_mem>> -> memref<1x!tpu.dma_semaphore, #tpu.memory_space<semaphore_mem>>
    %17 = tpu.memref_squeeze %16 : memref<1x!tpu.dma_semaphore, #tpu.memory_space<semaphore_mem>> -> memref<!tpu.dma_semaphore, #tpu.memory_space<semaphore_mem>>
    tpu.wait_dma2 semaphore(%17 : memref<!tpu.dma_semaphore, #tpu.memory_space<semaphore_mem>>) src(%arg1 : memref<1x1x64x128xf32, #tpu.memory_space<any>>) dst(%15 : memref<1x1x64x128xf32, #tpu.memory_space<any>>)
    %c2_i32_26 = arith.constant 2 : i32
    %c0_i32_27 = arith.constant 0 : i32
    %c2_i32_28 = arith.constant 2 : i32
    %c0_i32_29 = arith.constant 0 : i32
    %c0_i32_30 = arith.constant 0 : i32
    %18 = tpu.memref_slice %arg4[%c0_i32_27, %c2_i32_28, %c0_i32_29, %c0_i32_30] : memref<1x4x64x128xf32, #tpu.memory_space<any>> -> memref<1x1x64x128xf32, #tpu.memory_space<any>>
    %19 = tpu.memref_slice %arg5[%c2_i32_26] : memref<4x!tpu.dma_semaphore, #tpu.memory_space<semaphore_mem>> -> memref<1x!tpu.dma_semaphore, #tpu.memory_space<semaphore_mem>>
    %20 = tpu.memref_squeeze %19 : memref<1x!tpu.dma_semaphore, #tpu.memory_space<semaphore_mem>> -> memref<!tpu.dma_semaphore, #tpu.memory_space<semaphore_mem>>
    tpu.wait_dma2 semaphore(%20 : memref<!tpu.dma_semaphore, #tpu.memory_space<semaphore_mem>>) src(%arg2 : memref<1x1x64x128xf32, #tpu.memory_space<any>>) dst(%18 : memref<1x1x64x128xf32, #tpu.memory_space<any>>)
    %c3_i32_31 = arith.constant 3 : i32
    %c0_i32_32 = arith.constant 0 : i32
    %c3_i32_33 = arith.constant 3 : i32
    %c0_i32_34 = arith.constant 0 : i32
    %c0_i32_35 = arith.constant 0 : i32
    %21 = tpu.memref_slice %arg4[%c0_i32_32, %c3_i32_33, %c0_i32_34, %c0_i32_35] : memref<1x4x64x128xf32, #tpu.memory_space<any>> -> memref<1x1x64x128xf32, #tpu.memory_space<any>>
    %22 = tpu.memref_slice %arg5[%c3_i32_31] : memref<4x!tpu.dma_semaphore, #tpu.memory_space<semaphore_mem>> -> memref<1x!tpu.dma_semaphore, #tpu.memory_space<semaphore_mem>>
    %23 = tpu.memref_squeeze %22 : memref<1x!tpu.dma_semaphore, #tpu.memory_space<semaphore_mem>> -> memref<!tpu.dma_semaphore, #tpu.memory_space<semaphore_mem>>
    tpu.wait_dma2 semaphore(%23 : memref<!tpu.dma_semaphore, #tpu.memory_space<semaphore_mem>>) src(%arg3 : memref<1x1x64x128xf32, #tpu.memory_space<any>>) dst(%21 : memref<1x1x64x128xf32, #tpu.memory_space<any>>)
    return
  }
}

</mosaic_0001>

<bundles_post_ra>
// kernel: cat_slice_cat.1
= control target key start
LH: loop header
LB: loop body
LE: loop exit
PB: predicated region body
PF: predicated region fallthrough
CT: control target
= control target key end

     0   :  { %s118_s24 = smov [#allocation2]   ;;  %s119_s25 = smov [#allocation3]   ;;  %s180_s0 = inlined_call_operand.hbm [shape: f32[1,1,64,128], index: 0, kind: input, shape index: {}]   ;;  %s181_s4 = inlined_call_operand.hbm [shape: f32[1,4,64,128], index: 4, kind: output, shape index: {}]   ;;  %s182_s1 = inlined_call_operand.hbm [shape: f32[1,1,64,128], index: 1, kind: input, shape index: {}]   ;;  %s183_s2 = inlined_call_operand.hbm [shape: f32[1,1,64,128], index: 2, kind: input, shape index: {}]   ;;  %s184_s3 = inlined_call_operand.hbm [shape: f32[1,1,64,128], index: 3, kind: input, shape index: {}]  }
   0x1   :  { %s13_s17 = sshll.u32 %s180_s0, 4  ;;  %s15_s20 = sshll.u32 %s181_s4, 4  ;;  %s14_s17 = int_to_ptr.hbm [resolvable:$true] %s13_s17  ;;  %s16_s20 = int_to_ptr.hbm [resolvable:$true] %s15_s20 }
   0x2   :  { %s20_s23 = scalar_lea.hbm %s181_s4, 64  ;;  %s120_s26 = smov 0  }
   0x3   :  { %19 = dma.general %s14_s17, 1024, %s16_s20, %s118_s24, %s119_s25, [#allocation4], %s120_s26, 0  }
   0x4   :  { %s26_s29 = sshll.u32 %s182_s1, 4  ;;  %s28_s0 = sshll.u32 %s20_s23, 4  ;;  %s27_s29 = int_to_ptr.hbm [resolvable:$true] %s26_s29  ;;  %s29_s0 = int_to_ptr.hbm [resolvable:$true] %s28_s0 }
   0x5   :  { %s121_s30 = smov [#allocation2 + $0x1]   ;;  %s122_s5 = smov [#allocation5]  }
   0x6   :  { %32 = dma.general %s27_s29, 1024, %s29_s0, %s121_s30, %s122_s5, [#allocation6], %s120_s26, 0  }
   0x7   :  { %s33_s8 = scalar_lea.hbm %s181_s4, 128  ;;  %s39_s11 = sshll.u32 %s183_s2, 4  ;;  %s40_s11 = int_to_ptr.hbm [resolvable:$true] %s39_s11 }
   0x8   :  { %s41_s12 = sshll.u32 %s33_s8, 4  ;;  %s46_s14 = scalar_lea.hbm %s181_s4, 192  ;;  %s42_s12 = int_to_ptr.hbm [resolvable:$true] %s41_s12 }
   0x9   :  { %s123_s15 = smov [#allocation2 + $0x2]   ;;  %s124_s16 = smov [#allocation7]  }
   0xa   :  { %45 = dma.general %s40_s11, 1024, %s42_s12, %s123_s15, %s124_s16, [#allocation8], %s120_s26, 0  }
   0xb   :  { %s52_s19 = sshll.u32 %s184_s3, 4  ;;  %s54_s20 = sshll.u32 %s46_s14, 4  ;;  %s53_s19 = int_to_ptr.hbm [resolvable:$true] %s52_s19  ;;  %s55_s20 = int_to_ptr.hbm [resolvable:$true] %s54_s20 }
   0xc   :  { %s125_s21 = smov [#allocation2 + $0x3]   ;;  %s126_s2 = smov [#allocation9]  }
   0xd   :  { %58 = dma.general %s53_s19, 1024, %s55_s20, %s125_s21, %s126_s2, [#allocation10], %s120_s26, 0  }
   0xe   :  { %110 = dma.done.wait [#allocation2], 1024 }
   0xf   :  { %111 = vsyncadd [#allocation2], 4294966272 }
  0x10   :  { %112 = dma.done.wait [#allocation2 + $0x1], 1024 }
  0x11   :  { %113 = vsyncadd [#allocation2 + $0x1], 4294966272 }
  0x12   :  { %114 = dma.done.wait [#allocation2 + $0x2], 1024 }
  0x13   :  { %115 = vsyncadd [#allocation2 + $0x2], 4294966272 }
  0x14   :  { %116 = dma.done.wait [#allocation2 + $0x3], 1024 }
  0x15   :  { %117 = vsyncadd [#allocation2 + $0x3], 4294966272 }
  0x16   :  { %70 = vsyncmov [#allocation2] }
  0x19   :  { %s71_s4 = vpop.sfrf %70 }
  0x1a   :  { %p97_p0 = scmp.ne.s32.totalorder %s71_s4, 0 }
  0x1c   :  { %75 = shalt.err (%p97_p0)  }
  0x1d   :  { %77 = vsyncmov [#allocation2 + $0x1] }
  0x20   :  { %s78_s3 = vpop.sfrf %77 }
  0x21   :  { %p98_p1 = scmp.ne.s32.totalorder %s78_s3, 0 }
  0x23   :  { %82 = shalt.err (%p98_p1)  }
  0x24   :  { %84 = vsyncmov [#allocation2 + $0x2] }
  0x27   :  { %s85_s22 = vpop.sfrf %84 }
  0x28   :  { %p99_p2 = scmp.ne.s32.totalorder %s85_s22, 0 }
  0x2a   :  { %89 = shalt.err (%p99_p2)  }
  0x2b   :  { %91 = vsyncmov [#allocation2 + $0x3] }
  0x2e   :  { %s92_s23 = vpop.sfrf %91 }
  0x2f   :  { %p100_p3 = scmp.ne.s32.totalorder %s92_s23, 0 }
  0x31   :  { %96 = shalt.err (%p100_p3)  }

</bundles_post_ra>
